<compile_context>
chip_gen: v7x
topology: tpu7x:2x2x1
jax: 0.10.0
libtpu: 0.0.40
codegen_flags: <defaults>
</compile_context>

<pallas_src>
import functools

import numpy as np
import jax
import jax.numpy as jnp
from jax.experimental import pallas as pl
from jax.experimental.pallas import tpu as pltpu

MAX_ENT = 4                    # max entities per sentence
ENC = MAX_ENT * 3              # flattened (label_id, start, end) triples = 12
GROUP = 32                     # lanes per sentence group
SENT_PER_ROW = 4               # sentences packed per 128-lane row
LANES = GROUP * SENT_PER_ROW   # 128
# group-local lane layout: [0:12) pred, [12:24) tgt, 24 invalid, 25 fmt,
#                          26 spn, 27 valid, [28:32) pad
INV_LANE = 2 * ENC             # 24
FMT_LANE = INV_LANE + 1        # 25
SPN_LANE = INV_LANE + 2        # 26
VALID_LANE = INV_LANE + 3      # 27
# group-local output lanes for the match-derived counters
FP_LANE, TP_LANE, NEG_LANE = 3, 4, 5
CHUNK_MAX = 1024               # rows (of 4 sentences) per grid step


def _selector_mats_np():
    """Constant MXU selector matrices.

    a1:  per group, column j (<ENC) = pred_j - tgt_j  (difference matrix).
    a2:  per group, every column    = sum_j nz_j + 16*lane24 + 32*lane27
         (segment-sum + broadcast of the encoded scalar to all 32 lanes).
    """
    a1 = np.zeros((LANES, LANES), np.float32)
    a2 = np.zeros((LANES, LANES), np.float32)
    for g in range(SENT_PER_ROW):
        base = g * GROUP
        for j in range(ENC):
            a1[base + j, base + j] = 1.0
            a1[base + ENC + j, base + j] = -1.0
            a2[base + j, base:base + GROUP] = 1.0
        a2[base + INV_LANE, base:base + GROUP] = 16.0
        a2[base + VALID_LANE, base:base + GROUP] = 32.0
    return a1, a2


_A1_NP, _A2_NP = _selector_mats_np()


def _stats_kernel(packed_ref, a1_ref, a2_ref, out_ref):
    """Accumulate per-sentence counter contributions into the resident output.

    out group-local lanes: 3 false_positive, 4 true_positive, 5 negative,
                           24 invalid_sent, 25 format_negative, 26 span_negative.
    """
    @pl.when(pl.program_id(0) == 0)
    def _init():
        out_ref[...] = jnp.zeros_like(out_ref)

    x = packed_ref[...]                                   # [chunk, 128] int32
    x_f = x.astype(jnp.float32)
    lane = jax.lax.broadcasted_iota(jnp.int32, x.shape, 1)
    sub = lane & (GROUP - 1)                              # lane within a group

    # MXU pass 1: per-component (pred - tgt) differences at group lanes 0..11.
    d = jnp.dot(x_f, a1_ref[...], preferred_element_type=jnp.float32)
    nz = (d != 0.0).astype(jnp.float32)                   # 1.0 per mismatch

    # Encode the flags next to the mismatch indicators (nz is 0 there):
    #   lane 24 -> (invalid_raw > 0), lane 27 -> valid bit.
    inv_f = (x > 0).astype(jnp.float32)
    z = nz + jnp.where(sub == INV_LANE, inv_f,
                       jnp.where(sub == VALID_LANE, x_f, 0.0))

    # MXU pass 2: e = mismatch_count + 16*invalid + 32*valid, broadcast to the
    # whole 32-lane group (values <= 60, exact in f32).
    e = jnp.dot(z, a2_ref[...],
                preferred_element_type=jnp.float32).astype(jnp.int32)
    valid = (e >> 5) & 1
    inv = (e >> 4) & 1
    match = ((e & 15) == 0).astype(jnp.int32)
    mv = match * valid                 # exact match on a real (non-pad) sentence
    fp = mv * inv                      # matched but sentence flagged invalid
    tp = mv - fp                       # matched and valid
    neg = valid - mv                   # pred_entities != tgt_spans[idx]

    contrib = (jnp.where(sub == FP_LANE, fp,
               jnp.where(sub == TP_LANE, tp,
               jnp.where(sub == NEG_LANE, neg, 0)))
               + jnp.where(sub == INV_LANE, (x > 0).astype(jnp.int32),
                 jnp.where((sub == FMT_LANE) | (sub == SPN_LANE), x, 0)))
    out_ref[...] += contrib            # full unmasked (chunk, 128) accumulate


def _round_up(n, m):
    return ((n + m - 1) // m) * m


@functools.partial(jax.jit, static_argnames=("chunk_max",))
def icl_ner_stats(pred_enc, tgt_enc, flags, *, chunk_max=CHUNK_MAX):
    """Returns int32[6]: [invalid_sent, format_negative, span_negative,
                          false_positive, true_positive, negative]."""
    bt = pred_enc.shape[0]
    # One fused concatenate builds the 32-lane per-sentence record.
    per_sent = jnp.concatenate(
        [pred_enc.astype(jnp.int32),
         tgt_enc.astype(jnp.int32),
         flags.astype(jnp.int32),
         jnp.ones((bt, 1), jnp.int32),                       # valid bit
         jnp.zeros((bt, GROUP - VALID_LANE - 1), jnp.int32)],  # pad to 32
        axis=1)

    rows = pl.cdiv(bt, SENT_PER_ROW)
    chunk = min(chunk_max, _round_up(rows, 8))
    n_chunks = pl.cdiv(rows, chunk)
    padded_rows = n_chunks * chunk
    pad_sents = padded_rows * SENT_PER_ROW - bt
    if pad_sents:  # padding sentences are all-zero (valid=0) -> contribute nothing
        per_sent = jnp.pad(per_sent, ((0, pad_sents), (0, 0)))
    packed = per_sent.reshape(padded_rows, LANES)            # 4 sentences / row

    a1 = jnp.asarray(_A1_NP)
    a2 = jnp.asarray(_A2_NP)

    acc = pl.pallas_call(
        _stats_kernel,
        out_shape=jax.ShapeDtypeStruct((chunk, LANES), jnp.int32),
        grid_spec=pltpu.PrefetchScalarGridSpec(
            num_scalar_prefetch=0,
            grid=(n_chunks,),
            in_specs=[
                pl.BlockSpec((chunk, LANES), lambda i: (i, 0)),
                pl.BlockSpec((LANES, LANES), lambda i: (0, 0)),
                pl.BlockSpec((LANES, LANES), lambda i: (0, 0)),
            ],
            # resident accumulator: same output block for every grid step
            out_specs=pl.BlockSpec((chunk, LANES), lambda i: (0, 0)),
        ),
        compiler_params=pltpu.CompilerParams(
            dimension_semantics=("arbitrary",)),
    )(packed, a1, a2)

    # Tiny final reduce over rows and the 4 sentence groups (XLA-fused).
    totals = jnp.sum(acc.reshape(chunk * SENT_PER_ROW, GROUP), axis=0)
    return jnp.stack([totals[INV_LANE], totals[FMT_LANE], totals[SPN_LANE],
                      totals[FP_LANE], totals[TP_LANE],
                      totals[NEG_LANE]]).astype(jnp.int32)


if __name__ == "__main__":
    key = jax.random.PRNGKey(0)
    k1, k2, k3, k4 = jax.random.split(key, 4)

    BT = 64  # sentences in the batch (len(raw_words))

    # Deterministic synthetic "target" entity encodings (label_id, start, end).
    labels = jax.random.randint(k1, (BT, MAX_ENT, 1), 0, 5)
    starts = jax.random.randint(k2, (BT, MAX_ENT, 1), 0, 12)
    lens = jax.random.randint(k3, (BT, MAX_ENT, 1), 1, 4)
    tgt_enc = (jnp.concatenate([labels, starts, starts + lens], axis=-1)
               .reshape(BT, ENC).astype(jnp.int32))

    # Synthetic "pred" (stands in for the parsed LLM output): odd rows mismatch.
    perturb = (jnp.arange(BT) % 2).astype(jnp.int32)
    pred_enc = tgt_enc.at[:, 0].add(perturb)

    # Synthetic parser flags: (sent_invalid, format_negative, span_negative).
    flags = jax.random.randint(k4, (BT, 3), 0, 2).astype(jnp.int32)

    stats = jax.block_until_ready(icl_ner_stats(pred_enc, tgt_enc, flags))

    # Plain-JAX reference with the module's counter semantics.
    match = jnp.all(pred_enc == tgt_enc, axis=1)
    invalid = flags[:, 0] > 0
    ref = jnp.array([
        jnp.sum(invalid),
        jnp.sum(flags[:, 1]),
        jnp.sum(flags[:, 2]),
        jnp.sum(match & invalid),
        jnp.sum(match & ~invalid),
        jnp.sum(~match),
    ], dtype=jnp.int32)
    assert jnp.array_equal(stats, ref), (stats, ref)
    # Module invariant: true_positive + false_positive + negative == len(raw_words)
    assert int(stats[3]) + int(stats[4]) + int(stats[5]) == BT
    print("KERNEL_OK")
</pallas_src>

<mosaic_0001>
module attributes {stable_mosaic.version = 11 : i64} {
  func.func @_stats_kernel(%arg0: i32, %arg1: memref<16x128xi32, #tpu.memory_space<vmem>>, %arg2: memref<128x128xf32, #tpu.memory_space<vmem>>, %arg3: memref<128x128xf32, #tpu.memory_space<vmem>>, %arg4: memref<16x128xi32, #tpu.memory_space<vmem>>) attributes {dimension_semantics = [#tpu.dimension_semantics<arbitrary>], iteration_bounds = array<i64: 1>, scalar_prefetch = 0 : i64, scratch_operands = 0 : i64, tpu.core_type = #tpu.core_type<tc>, window_params = [{transform_indices = @transform_0, window_bounds = array<i64: 16, 128>}, {pipeline_mode = #tpu.pipeline_mode<synchronous>, transform_indices = @transform_1, window_bounds = array<i64: 128, 128>}, {pipeline_mode = #tpu.pipeline_mode<synchronous>, transform_indices = @transform_2, window_bounds = array<i64: 128, 128>}, {pipeline_mode = #tpu.pipeline_mode<synchronous>, transform_indices = @transform_3, window_bounds = array<i64: 16, 128>}]} {
    %c0_i32 = arith.constant 0 : i32
    %0 = arith.cmpi eq, %arg0, %c0_i32 : i32
    %1 = arith.extui %0 : i1 to i32
    %c0_i32_0 = arith.constant 0 : i32
    %2 = arith.cmpi ne, %1, %c0_i32_0 : i32
    scf.if %2 {
      %c0_i32_22 = arith.constant 0 : i32
      %73 = vector.broadcast %c0_i32_22 : i32 to vector<16x128xi32>
      %c0_23 = arith.constant 0 : index
      %c0_24 = arith.constant 0 : index
      %74 = vector.load %arg4[%c0_23, %c0_24] : memref<16x128xi32, #tpu.memory_space<vmem>>, vector<16x128xi32>
      tpu.vector_store %arg4[%c0_23, %c0_24], %73 {strides = array<i32>} : memref<16x128xi32, #tpu.memory_space<vmem>>, vector<16x128xi32>,
    } else {
    }
    %c0 = arith.constant 0 : index
    %c0_1 = arith.constant 0 : index
    %3 = vector.load %arg1[%c0, %c0_1] : memref<16x128xi32, #tpu.memory_space<vmem>>, vector<16x128xi32>
    %4 = arith.sitofp %3 : vector<16x128xi32> to vector<16x128xf32>
    %5 = tpu.iota {dimensions = array<i32: 1>} : vector<16x128xi32>
    %c31_i32 = arith.constant 31 : i32
    %6 = vector.broadcast %c31_i32 : i32 to vector<16x128xi32>
    %7 = arith.andi %5, %6 : vector<16x128xi32>
    %c0_2 = arith.constant 0 : index
    %c0_3 = arith.constant 0 : index
    %8 = vector.load %arg2[%c0_2, %c0_3] : memref<128x128xf32, #tpu.memory_space<vmem>>, vector<128x128xf32>
    %cst = arith.constant dense<0.000000e+00> : vector<16x128xf32>
    %9 = tpu.matmul %4, %8, %cst {dimension_numbers = #tpu.dot_dimension_numbers<[1], [0], [0], [1], [0, 0, 1, 1], [], []>} : vector<16x128xf32>, vector<128x128xf32>, vector<16x128xf32> -> vector<16x128xf32>
    %cst_4 = arith.constant 0.000000e+00 : f32
    %10 = vector.broadcast %cst_4 : f32 to vector<16x128xf32>
    %11 = arith.cmpf one, %9, %10 : vector<16x128xf32>
    %12 = arith.extui %11 : vector<16x128xi1> to vector<16x128xi32>
    %13 = arith.sitofp %12 : vector<16x128xi32> to vector<16x128xf32>
    %c0_i32_5 = arith.constant 0 : i32
    %14 = vector.broadcast %c0_i32_5 : i32 to vector<16x128xi32>
    %15 = arith.cmpi sgt, %3, %14 : vector<16x128xi32>
    %16 = arith.extui %15 : vector<16x128xi1> to vector<16x128xi32>
    %17 = arith.sitofp %16 : vector<16x128xi32> to vector<16x128xf32>
    %c24_i32 = arith.constant 24 : i32
    %18 = vector.broadcast %c24_i32 : i32 to vector<16x128xi32>
    %19 = arith.cmpi eq, %7, %18 : vector<16x128xi32>
    %c27_i32 = arith.constant 27 : i32
    %20 = vector.broadcast %c27_i32 : i32 to vector<16x128xi32>
    %21 = arith.cmpi eq, %7, %20 : vector<16x128xi32>
    %cst_6 = arith.constant 0.000000e+00 : f32
    %22 = vector.broadcast %cst_6 : f32 to vector<16x128xf32>
    %23 = arith.select %21, %4, %22 : vector<16x128xi1>, vector<16x128xf32>
    %24 = arith.select %19, %17, %23 : vector<16x128xi1>, vector<16x128xf32>
    %25 = arith.addf %13, %24 : vector<16x128xf32>
    %c0_7 = arith.constant 0 : index
    %c0_8 = arith.constant 0 : index
    %26 = vector.load %arg3[%c0_7, %c0_8] : memref<128x128xf32, #tpu.memory_space<vmem>>, vector<128x128xf32>
    %cst_9 = arith.constant dense<0.000000e+00> : vector<16x128xf32>
    %27 = tpu.matmul %25, %26, %cst_9 {dimension_numbers = #tpu.dot_dimension_numbers<[1], [0], [0], [1], [0, 0, 1, 1], [], []>} : vector<16x128xf32>, vector<128x128xf32>, vector<16x128xf32> -> vector<16x128xf32>
    %28 = arith.fptosi %27 : vector<16x128xf32> to vector<16x128xi32>
    %c5_i32 = arith.constant 5 : i32
    %29 = vector.broadcast %c5_i32 : i32 to vector<16x128xi32>
    %30 = arith.shrsi %28, %29 : vector<16x128xi32>
    %c1_i32 = arith.constant 1 : i32
    %31 = vector.broadcast %c1_i32 : i32 to vector<16x128xi32>
    %32 = arith.andi %30, %31 : vector<16x128xi32>
    %c4_i32 = arith.constant 4 : i32
    %33 = vector.broadcast %c4_i32 : i32 to vector<16x128xi32>
    %34 = arith.shrsi %28, %33 : vector<16x128xi32>
    %c1_i32_10 = arith.constant 1 : i32
    %35 = vector.broadcast %c1_i32_10 : i32 to vector<16x128xi32>
    %36 = arith.andi %34, %35 : vector<16x128xi32>
    %c15_i32 = arith.constant 15 : i32
    %37 = vector.broadcast %c15_i32 : i32 to vector<16x128xi32>
    %38 = arith.andi %28, %37 : vector<16x128xi32>
    %c0_i32_11 = arith.constant 0 : i32
    %39 = vector.broadcast %c0_i32_11 : i32 to vector<16x128xi32>
    %40 = arith.cmpi eq, %38, %39 : vector<16x128xi32>
    %41 = arith.extui %40 : vector<16x128xi1> to vector<16x128xi32>
    %42 = arith.muli %41, %32 : vector<16x128xi32>
    %43 = arith.muli %42, %36 : vector<16x128xi32>
    %44 = arith.subi %42, %43 : vector<16x128xi32>
    %45 = arith.subi %32, %42 : vector<16x128xi32>
    %c3_i32 = arith.constant 3 : i32
    %46 = vector.broadcast %c3_i32 : i32 to vector<16x128xi32>
    %47 = arith.cmpi eq, %7, %46 : vector<16x128xi32>
    %c4_i32_12 = arith.constant 4 : i32
    %48 = vector.broadcast %c4_i32_12 : i32 to vector<16x128xi32>
    %49 = arith.cmpi eq, %7, %48 : vector<16x128xi32>
    %c5_i32_13 = arith.constant 5 : i32
    %50 = vector.broadcast %c5_i32_13 : i32 to vector<16x128xi32>
    %51 = arith.cmpi eq, %7, %50 : vector<16x128xi32>
    %c0_i32_14 = arith.constant 0 : i32
    %52 = vector.broadcast %c0_i32_14 : i32 to vector<16x128xi32>
    %53 = arith.select %51, %45, %52 : vector<16x128xi1>, vector<16x128xi32>
    %54 = arith.select %49, %44, %53 : vector<16x128xi1>, vector<16x128xi32>
    %55 = arith.select %47, %43, %54 : vector<16x128xi1>, vector<16x128xi32>
    %c24_i32_15 = arith.constant 24 : i32
    %56 = vector.broadcast %c24_i32_15 : i32 to vector<16x128xi32>
    %57 = arith.cmpi eq, %7, %56 : vector<16x128xi32>
    %c0_i32_16 = arith.constant 0 : i32
    %58 = vector.broadcast %c0_i32_16 : i32 to vector<16x128xi32>
    %59 = arith.cmpi sgt, %3, %58 : vector<16x128xi32>
    %60 = arith.extui %59 : vector<16x128xi1> to vector<16x128xi32>
    %c25_i32 = arith.constant 25 : i32
    %61 = vector.broadcast %c25_i32 : i32 to vector<16x128xi32>
    %62 = arith.cmpi eq, %7, %61 : vector<16x128xi32>
    %c26_i32 = arith.constant 26 : i32
    %63 = vector.broadcast %c26_i32 : i32 to vector<16x128xi32>
    %64 = arith.cmpi eq, %7, %63 : vector<16x128xi32>
    %65 = arith.ori %62, %64 : vector<16x128xi1>
    %c0_i32_17 = arith.constant 0 : i32
    %66 = vector.broadcast %c0_i32_17 : i32 to vector<16x128xi32>
    %67 = arith.select %65, %3, %66 : vector<16x128xi1>, vector<16x128xi32>
    %68 = arith.select %57, %60, %67 : vector<16x128xi1>, vector<16x128xi32>
    %69 = arith.addi %55, %68 : vector<16x128xi32>
    %c0_18 = arith.constant 0 : index
    %c0_19 = arith.constant 0 : index
    %70 = vector.load %arg4[%c0_18, %c0_19] : memref<16x128xi32, #tpu.memory_space<vmem>>, vector<16x128xi32>
    %71 = arith.addi %70, %69 : vector<16x128xi32>
    %c0_20 = arith.constant 0 : index
    %c0_21 = arith.constant 0 : index
    %72 = vector.load %arg4[%c0_20, %c0_21] : memref<16x128xi32, #tpu.memory_space<vmem>>, vector<16x128xi32>
    tpu.vector_store %arg4[%c0_20, %c0_21], %71 {strides = array<i32>} : memref<16x128xi32, #tpu.memory_space<vmem>>, vector<16x128xi32>,
    return
  }
  func.func @transform_0(%arg0: i32) -> (i32, i32) {
    %c0_i32 = arith.constant 0 : i32
    %c0_i32_0 = arith.constant 0 : i32
    return %arg0, %c0_i32 : i32, i32
  }
  func.func @transform_1(%arg0: i32) -> (i32, i32) {
    %c0_i32 = arith.constant 0 : i32
    %c0_i32_0 = arith.constant 0 : i32
    %c0_i32_1 = arith.constant 0 : i32
    return %c0_i32, %c0_i32_0 : i32, i32
  }
  func.func @transform_2(%arg0: i32) -> (i32, i32) {
    %c0_i32 = arith.constant 0 : i32
    %c0_i32_0 = arith.constant 0 : i32
    %c0_i32_1 = arith.constant 0 : i32
    return %c0_i32, %c0_i32_0 : i32, i32
  }
  func.func @transform_3(%arg0: i32) -> (i32, i32) {
    %c0_i32 = arith.constant 0 : i32
    %c0_i32_0 = arith.constant 0 : i32
    %c0_i32_1 = arith.constant 0 : i32
    return %c0_i32, %c0_i32_0 : i32, i32
  }
}

</mosaic_0001>

<bundles_post_ra>
// kernel: icl_ner_stats.1
= control target key start
LH: loop header
LB: loop body
LE: loop exit
PB: predicated region body
PF: predicated region fallthrough
CT: control target
= control target key end

     0   :  { %v24_v49 = vlaneseq  ;;  %v461_v57 = vmov 0   ;;  %v462_v63 = vmov 0.0   ;;  %s627_s1 = inlined_call_operand.vmem [shape: f32[128,128], index: 1, kind: input, shape index: {}]   ;;  %s628_s0 = inlined_call_operand.vmem [shape: s32[16,128], index: 0, kind: input, shape index: {}]   ;;  %s629_s2 = inlined_call_operand.vmem [shape: f32[128,128], index: 2, kind: input, shape index: {}]   ;;  %s630_s3 = inlined_call_operand.vmem [shape: s32[16,128], index: 3, kind: output, shape index: {}]  }
   0x1   :  { %v27_v0 = vld [vmem:[%s627_s1] sm:$0xff]  ;;  %v28_v1 = vld [vmem:[%s627_s1 + $0x8] sm:$0xff]  ;;  %v29_v2 = vld [vmem:[%s627_s1 + $0x10] sm:$0xff] }
   0x2   :  { %v391_v3 = vpack.c.bf16 %v28_v1, %v27_v0  ;;  %v30_v4 = vld [vmem:[%s627_s1 + $0x18] sm:$0xff]  ;;  %v31_v6 = vld [vmem:[%s627_s1 + $0x20] sm:$0xff]  ;;  %v32_v7 = vld [vmem:[%s627_s1 + $0x28] sm:$0xff]  ;;  %v25_v50 = vand.u32 127, %v24_v49 }
   0x3   :  { %v395_v5 = vpack.c.bf16 %v30_v4, %v29_v2  ;;  %v399_v8 = vpack.c.bf16 %v32_v7, %v31_v6  ;;  %v33_v9 = vld [vmem:[%s627_s1 + $0x30] sm:$0xff]  ;;  %v507_v10 = vld [vmem:[%s628_s0] sm:$0xff]  ;;  %v34_v11 = vld [vmem:[%s627_s1 + $0x38] sm:$0xff] }
   0x4   :  { %392 = vmatprep.subr.bf16.mxu0 %v391_v3  ;;  %v22_v12 = vcvt.s32.f32 %v507_v10  ;;  %v138_v13 = vld [vmem:[%s629_s2] sm:$0xff]  ;;  %v139_v14 = vld [vmem:[%s629_s2 + $0x8] sm:$0xff]  ;;  %v140_v16 = vld [vmem:[%s629_s2 + $0x10] sm:$0xff]  ;;  %v403_v21 = vpack.c.bf16 %v34_v11, %v33_v9  ;;  %v584_v51 = vand.u32 31, %v25_v50  ;;  %vm124_vm5 = vcmp.gt.s32.totalorder %v507_v10, 0 }
   0x5   :  { %394 = vmatpush3.bf16.msra.mxu0 %v391_v3  ;;  %v423_v15 = vpack.c.bf16 %v139_v14, %v138_v13  ;;  %v141_v17 = vld [vmem:[%s629_s2 + $0x18] sm:$0xff]  ;;  %v142_v19 = vld [vmem:[%s629_s2 + $0x20] sm:$0xff]  ;;  %v143_v20 = vld [vmem:[%s629_s2 + $0x28] sm:$0xff]  ;;  %v126_v61 = vsel %vm124_vm5, 1, %v461_v57  ;;  %v283_v0 = vsel %vm124_vm5, 1.0, %v462_v63 }
   0x6   :  { %396 = vmatprep.subr.bf16.mxu0 %v395_v5  ;;  %353 = vmatprep.mubr.f32.mxu0 %v22_v12  ;;  %v427_v18 = vpack.c.bf16 %v141_v17, %v140_v16  ;;  %v35_v22 = vld [vmem:[%s627_s1 + $0x40] sm:$0xff]  ;;  %v36_v23 = vld [vmem:[%s627_s1 + $0x48] sm:$0xff]  ;;  %v431_v24 = vpack.c.bf16 %v143_v20, %v142_v19  ;;  %v144_v25 = vld [vmem:[%s629_s2 + $0x30] sm:$0xff]  ;;  %vm262_vm0 = vcmp.eq.s32.totalorder %v584_v51, 25  ;;  %vm263_vm1 = vcmp.eq.s32.totalorder %v584_v51, 26 }
   0x7   :  { %424 = vmatprep.subr.bf16.mxu1 %v423_v15  ;;  %v145_v26 = vld [vmem:[%s629_s2 + $0x38] sm:$0xff]  ;;  %v407_v27 = vpack.c.bf16 %v36_v23, %v35_v22  ;;  %v37_v28 = vld [vmem:[%s627_s1 + $0x50] sm:$0xff]  ;;  %v146_v31 = vld [vmem:[%s629_s2 + $0x40] sm:$0xff]  ;;  %vm130_vm4 = vcmp.eq.s32.totalorder %v584_v51, 24  ;;  %vm131_vm6 = vcmp.eq.s32.totalorder %v584_v51, 27  ;;  %vm255_vm11 = vcmp.eq.s32.totalorder %v584_v51, 5 }
   0x8   :  { %426 = vmatpush3.bf16.msra.mxu1 %v423_v15  ;;  %v38_v29 = vld [vmem:[%s627_s1 + $0x58] sm:$0xff]  ;;  %v435_v30 = vpack.c.bf16 %v145_v26, %v144_v25  ;;  %v147_v32 = vld [vmem:[%s629_s2 + $0x48] sm:$0xff]  ;;  %v39_v34 = vld [vmem:[%s627_s1 + $0x60] sm:$0xff]  ;;  %v132_v1 = vsel %vm131_vm6, %v22_v12, 0.0  ;;  %vm254_vm12 = vcmp.eq.s32.totalorder %v584_v51, 4  ;;  %vm253_vm13 = vcmp.eq.s32.totalorder %v584_v51, 3 }
   0x9   :  { %398 = vmatpush3.bf16.msra.mxu0 %v395_v5  ;;  %428 = vmatprep.subr.bf16.mxu1 %v427_v18  ;;  %v411_v33 = vpack.c.bf16 %v38_v29, %v37_v28  ;;  %v40_v35 = vld [vmem:[%s627_s1 + $0x68] sm:$0xff]  ;;  %v439_v36 = vpack.c.bf16 %v147_v32, %v146_v31  ;;  %v148_v37 = vld [vmem:[%s629_s2 + $0x50] sm:$0xff]  ;;  %v149_v38 = vld [vmem:[%s629_s2 + $0x58] sm:$0xff]  ;;  %v134_v6 = vsel %vm130_vm4, %v283_v0, %v132_v1 }
   0xa   :  { %400 = vmatprep.subr.bf16.mxu0 %v399_v8  ;;  %v415_v39 = vpack.c.bf16 %v40_v35, %v39_v34  ;;  %v41_v40 = vld [vmem:[%s627_s1 + $0x70] sm:$0xff]  ;;  %v42_v41 = vld [vmem:[%s627_s1 + $0x78] sm:$0xff]  ;;  %v443_v42 = vpack.c.bf16 %v149_v38, %v148_v37  ;;  %v150_v43 = vld [vmem:[%s629_s2 + $0x60] sm:$0xff] }
   0xb   :  { %v151_v44 = vld [vmem:[%s629_s2 + $0x68] sm:$0xff]  ;;  %v419_v45 = vpack.c.bf16 %v42_v41, %v41_v40  ;;  %vm588_vm2 = vmor %vm262_vm0, %vm263_vm1  ;;  %v152_v54 = vld [vmem:[%s629_s2 + $0x70] sm:$0xff] }
   0xc   :  { %430 = vmatpush3.bf16.msra.mxu1 %v427_v18  ;;  %v447_v46 = vpack.c.bf16 %v151_v44, %v150_v43  ;;  %v21_v47 = vld [vmem:[%s628_s0 + $0x8] sm:$0xff]  ;;  %v153_v55 = vld [vmem:[%s629_s2 + $0x78] sm:$0xff]  ;;  %v265_v59 = vsel %vm588_vm2, %v507_v10, 0 }
   0xd   :  { %402 = vmatpush3.bf16.msra.mxu0 %v399_v8  ;;  %432 = vmatprep.subr.bf16.mxu1 %v431_v24  ;;  %v23_v48 = vcvt.s32.f32 %v21_v47  ;;  %v266_v53 = vsel %vm588_vm2, %v21_v47, 0  ;;  %vm125_vm3 = vcmp.gt.s32.totalorder %v21_v47, 0  ;;  %v451_v56 = vpack.c.bf16 %v153_v55, %v152_v54 }
   0xe   :  { %404 = vmatprep.subr.bf16.mxu0 %v403_v21  ;;  %v127_v58 = vsel %vm125_vm3, 1, %v461_v57  ;;  %v267_v62 = vsel %vm130_vm4, %v126_v61, %v265_v59  ;;  %v284_v2 = vsel %vm125_vm3, 1.0, %v462_v63 }
   0xf   :  { %v268_v60 = vsel %vm130_vm4, %v127_v58, %v266_v53  ;;  %v133_v3 = vsel %vm131_vm6, %v23_v48, 0.0 }
  0x10   :  { %434 = vmatpush3.bf16.msra.mxu1 %v431_v24  ;;  %v135_v8 = vsel %vm130_vm4, %v284_v2, %v133_v3 }
  0x11   :  { %406 = vmatpush3.bf16.msra.mxu0 %v403_v21  ;;  %436 = vmatprep.subr.bf16.mxu1 %v435_v30 }
  0x12   :  { %408 = vmatprep.subr.bf16.mxu0 %v407_v27 }
  0x14   :  { %438 = vmatpush3.bf16.msra.mxu1 %v435_v30 }
  0x15   :  { %410 = vmatpush3.bf16.msra.mxu0 %v407_v27  ;;  %440 = vmatprep.subr.bf16.mxu1 %v439_v36 }
  0x16   :  { %412 = vmatprep.subr.bf16.mxu0 %v411_v33 }
  0x18   :  { %442 = vmatpush3.bf16.msra.mxu1 %v439_v36 }
  0x19   :  { %414 = vmatpush3.bf16.msra.mxu0 %v411_v33  ;;  %444 = vmatprep.subr.bf16.mxu1 %v443_v42 }
  0x1a   :  { %416 = vmatprep.subr.bf16.mxu0 %v415_v39 }
  0x1c   :  { %446 = vmatpush3.bf16.msra.mxu1 %v443_v42 }
  0x1d   :  { %418 = vmatpush3.bf16.msra.mxu0 %v415_v39  ;;  %448 = vmatprep.subr.bf16.mxu1 %v447_v46 }
  0x1e   :  { %420 = vmatprep.subr.bf16.mxu0 %v419_v45 }
  0x20   :  { %450 = vmatpush3.bf16.msra.mxu1 %v447_v46 }
  0x21   :  { %422 = vmatpush3.bf16.msra.mxu0 %v419_v45  ;;  %452 = vmatprep.subr.bf16.mxu1 %v451_v56 }
  0x24   :  { %354 = vmatmul.mubr.f32.vlgmr.msra.gmra.mrb[0].mxu0 %v23_v48  ;;  %454 = vmatpush3.bf16.msra.mxu1 %v451_v56 }
  0xf7   :  { %v355_v4 = vpop.f32.mrb[0].mxu0 }
  0xf8   :  { %vm119_vm7 = vcmp.ne.f32.partialorder %v355_v4, 0.0  ;;  %v109_v5 = vpop.f32.mrb[1].mxu0 }
  0xf9   :  { %v282_v7 = vsel %vm119_vm7, 1.0, %v462_v63  ;;  %vm118_vm8 = vcmp.ne.f32.partialorder %v109_v5, 0.0 }
  0xfa   :  { %v281_v9 = vsel %vm118_vm8, 1.0, %v462_v63  ;;  %v137_v13 = vadd.f32 %v282_v7, %v135_v8 }
  0xfb   :  { %v136_v11 = vadd.f32 %v281_v9, %v134_v6 }
  0xfd   :  { %388 = vmatprep.mubr.f32.mxu1 %v136_v11 }
  0xfe   :  { %389 = vmatmul.mubr.f32.vlgmr.msra.gmra.mrb[0].mxu1 %v137_v13 }
 0x1d1   :  { %v390_v10 = vpop.f32.mrb[0].mxu1 }
 0x1d2   :  { %v457_v12 = vtrunc.f32 %v390_v10  ;;  %v220_v14 = vpop.f32.mrb[1].mxu1 }
 0x1d3   :  { %v455_v15 = vtrunc.f32 %v220_v14 }
 0x1d4   :  { %v458_v16 = vcvt.f32.s32 %v457_v12 }
 0x1d5   :  { %v456_v17 = vcvt.f32.s32 %v455_v15 }
 0x1d6   :  { %v232_v18 = vshra.s32 %v458_v16, 5  ;;  %v236_v19 = vshra.s32 %v458_v16, 4  ;;  %v240_v20 = vand.u32 15, %v458_v16 }
 0x1d7   :  { %v231_v21 = vshra.s32 %v456_v17, 5  ;;  %v235_v22 = vshra.s32 %v456_v17, 4  ;;  %v239_v23 = vand.u32 15, %v456_v17 }
 0x1d8   :  { %v234_v24 = vand.u32 1, %v232_v18  ;;  %vm242_vm9 = vcmp.eq.s32.totalorder %v240_v20, 0  ;;  %v238_v27 = vand.u32 1, %v236_v19 }
 0x1d9   :  { %v244_v25 = vsel %vm242_vm9, 1, %v461_v57  ;;  %v233_v26 = vand.u32 1, %v231_v21  ;;  %vm241_vm10 = vcmp.eq.s32.totalorder %v239_v23, 0  ;;  %v237_v30 = vand.u32 1, %v235_v22 }
 0x1da   :  { %v246_v28 = vmul.u32 %v244_v25, %v234_v24  ;;  %v243_v29 = vsel %vm241_vm10, 1, %v461_v57 }
 0x1db   :  { %v245_v31 = vmul.u32 %v243_v29, %v233_v26 }
 0x1dc   :  { %v248_v32 = vmul.u32 %v246_v28, %v238_v27  ;;  %v252_v33 = vsub.s32 %v234_v24, %v246_v28 }
 0x1dd   :  { %v247_v34 = vmul.u32 %v245_v31, %v237_v30  ;;  %v251_v35 = vsub.s32 %v233_v26, %v245_v31 }
 0x1de   :  { %v250_v36 = vsub.s32 %v246_v28, %v248_v32  ;;  %v257_v37 = vsel %vm255_vm11, %v252_v33, 0 }
 0x1df   :  { %v249_v38 = vsub.s32 %v245_v31, %v247_v34  ;;  %v256_v39 = vsel %vm255_vm11, %v251_v35, 0 }
 0x1e0   :  { %v259_v40 = vsel %vm254_vm12, %v250_v36, %v257_v37 }
 0x1e1   :  { %v261_v41 = vsel %vm253_vm13, %v248_v32, %v259_v40  ;;  %v258_v42 = vsel %vm254_vm12, %v249_v38, %v256_v39 }
 0x1e2   :  { %v270_v43 = vadd.s32 %v268_v60, %v261_v41  ;;  %v260_v44 = vsel %vm253_vm13, %v247_v34, %v258_v42 }
 0x1e3   :  { %v269_v45 = vadd.s32 %v267_v62, %v260_v44 }
 0x1e4   :  { %276 = vst [vmem:[%s630_s3 + $0x8] sm:$0xff] %v270_v43 }
 0x1e5   :  { %275 = vst [vmem:[%s630_s3] sm:$0xff] %v269_v45 }

</bundles_post_ra>
